<compile_context>
chip_gen: v7x
topology: tpu7x:2x2x1
jax: 0.10.0
libtpu: 0.0.40
codegen_flags: <defaults>
</compile_context>

<pallas_src>
import functools
import math

import jax
import jax.numpy as jnp
from jax import lax
from jax.experimental import pallas as pl
from jax.experimental.pallas import tpu as pltpu

LANES = 128
TILE_ROWS_MAX = 2048  # (2048, 128) f32 block = 1 MiB per input per buffer


def _regl1_kernel(pred_ref, targ_ref, out_ref, acc_ref, *,
                  tile_rows, valid_rows, need_mask):
    """Accumulates {sum(sl1), sum(sl1*fg), sum(fg)} -> SMEM out_ref (3,)."""
    i = pl.program_id(0)

    @pl.when(i == 0)
    def _init():
        acc_ref[...] = jnp.zeros_like(acc_ref)

    p = pred_ref[...].astype(jnp.float32)
    t = targ_ref[...].astype(jnp.float32)

    fg = (t > 0.0).astype(jnp.float32)          # foreground mask
    d = p - t
    ad = jnp.abs(d)
    # SmoothL1 with default beta = 1.0
    sl1 = jnp.where(ad < 1.0, 0.5 * d * d, ad - 0.5)

    if need_mask:
        # Last grid block may extend past the real rows; mask garbage rows.
        row_ids = i * tile_rows + lax.broadcasted_iota(
            jnp.int32, (tile_rows, LANES), 0)
        valid = (row_ids < valid_rows).astype(jnp.float32)
        sl1 = sl1 * valid
        fg = fg * valid

    fg_sl1 = sl1 * fg

    # Vector (VALU-only) accumulation into an (8,128) vreg slab per quantity.
    groups = tile_rows // 8
    acc_ref[0] += jnp.sum(sl1.reshape(groups, 8, LANES), axis=0)
    acc_ref[1] += jnp.sum(fg_sl1.reshape(groups, 8, LANES), axis=0)
    acc_ref[2] += jnp.sum(fg.reshape(groups, 8, LANES), axis=0)

    @pl.when(i == pl.num_programs(0) - 1)
    def _finalize():
        out_ref[0] = jnp.sum(acc_ref[0])
        out_ref[1] = jnp.sum(acc_ref[1])
        out_ref[2] = jnp.sum(acc_ref[2])


@jax.jit
def reg_l1_loss(pred, target):
    """Pallas implementation of RegL1Loss.forward (scalar float32 output)."""
    assert pred.shape == target.shape
    n_valid = math.prod(pred.shape)

    # Minimum sublane alignment per dtype (f32: 8, bf16: 16, int8/fp8: 32).
    itemsize = min(jnp.dtype(pred.dtype).itemsize, jnp.dtype(target.dtype).itemsize)
    sublane_mult = max(8, 32 // max(itemsize, 1))
    align_elems = sublane_mult * LANES

    pred_f = jnp.ravel(pred)        # reshape of contiguous array: free
    targ_f = jnp.ravel(target)

    n_pad = (-n_valid) % align_elems
    if n_pad:  # only for irregular sizes; padded zeros contribute 0 loss / 0 fg
        pred_f = jnp.pad(pred_f, (0, n_pad))
        targ_f = jnp.pad(targ_f, (0, n_pad))
    rows = (n_valid + n_pad) // LANES

    tile_rows = min(TILE_ROWS_MAX, rows)        # multiple of sublane_mult
    grid_size = pl.cdiv(rows, tile_rows)
    need_mask = (rows % tile_rows) != 0

    kernel = functools.partial(
        _regl1_kernel,
        tile_rows=tile_rows,
        valid_rows=rows,
        need_mask=need_mask,
    )

    sums = pl.pallas_call(
        kernel,
        out_shape=jax.ShapeDtypeStruct((3,), jnp.float32),
        grid_spec=pltpu.PrefetchScalarGridSpec(
            num_scalar_prefetch=0,
            grid=(grid_size,),
            in_specs=[
                pl.BlockSpec((tile_rows, LANES), lambda i: (i, 0)),
                pl.BlockSpec((tile_rows, LANES), lambda i: (i, 0)),
            ],
            out_specs=pl.BlockSpec(memory_space=pltpu.SMEM),
            scratch_shapes=[pltpu.VMEM((3, 8, LANES), jnp.float32)],
        ),
        compiler_params=pltpu.CompilerParams(
            dimension_semantics=("arbitrary",),
        ),
    )(pred_f.reshape(rows, LANES), targ_f.reshape(rows, LANES))

    total_sl1 = sums[0]
    fg_sl1_sum = sums[1]
    fg_count = sums[2]

    bg_sl1_sum = total_sl1 - fg_sl1_sum
    bg_count = jnp.float32(n_valid) - fg_count  # padding excluded by construction

    fore_loss = fg_sl1_sum / fg_count
    back_loss = bg_sl1_sum / bg_count
    return back_loss + fore_loss


def _reference(pred, target):
    """Plain-JAX reference mirroring the PyTorch module."""
    p = pred.astype(jnp.float32)
    t = target.astype(jnp.float32)
    fg = (t > 0).astype(jnp.float32)
    bg = 1.0 - fg
    d = p - t
    ad = jnp.abs(d)
    sl1 = jnp.where(ad < 1.0, 0.5 * d * d, ad - 0.5)
    fore = jnp.sum(sl1 * fg) / jnp.sum(fg)
    back = jnp.sum(sl1 * bg) / jnp.sum(bg)
    return back + fore


if __name__ == "__main__":
    key = jax.random.PRNGKey(0)
    k1, k2 = jax.random.split(key)
    # (batch, c, z, y, x) as implied by the module docstring.
    shape = (2, 4, 8, 8, 8)
    pred = jax.random.normal(k1, shape, dtype=jnp.float32)
    # Target: mix of positives (foreground) and zeros (background).
    target = jax.random.normal(k2, shape, dtype=jnp.float32)
    target = jnp.where(target > 0.5, target, 0.0)

    out = reg_l1_loss(pred, target)
    out = jax.block_until_ready(out)

    ref = _reference(pred, target)
    assert jnp.allclose(out, ref, rtol=1e-5, atol=1e-5), (out, ref)
    print("KERNEL_OK")
</pallas_src>

<mosaic_0001>
module attributes {stable_mosaic.version = 11 : i64} {
  func.func @_regl1_kernel(%arg0: i32, %arg1: memref<32x128xf32, #tpu.memory_space<vmem>>, %arg2: memref<32x128xf32, #tpu.memory_space<vmem>>, %arg3: memref<3xf32, #tpu.memory_space<smem>>, %arg4: memref<3x8x128xf32, #tpu.memory_space<vmem>>) attributes {dimension_semantics = [#tpu.dimension_semantics<arbitrary>], iteration_bounds = array<i64: 1>, scalar_prefetch = 0 : i64, scratch_operands = 1 : i64, tpu.core_type = #tpu.core_type<tc>, window_params = [{transform_indices = @transform_0, window_bounds = array<i64: 32, 128>}, {transform_indices = @transform_1, window_bounds = array<i64: 32, 128>}, {transform_indices = @transform_2, window_bounds = array<i64: 3>}]} {
    %c0_i32 = arith.constant 0 : i32
    %0 = arith.cmpi eq, %arg0, %c0_i32 : i32
    %1 = arith.extui %0 : i1 to i32
    %c0_i32_0 = arith.constant 0 : i32
    %2 = arith.cmpi ne, %1, %c0_i32_0 : i32
    scf.if %2 {
      %cst_28 = arith.constant 0.000000e+00 : f32
      %47 = vector.broadcast %cst_28 : f32 to vector<3x8x128xf32>
      %c0_29 = arith.constant 0 : index
      %c0_30 = arith.constant 0 : index
      %c0_31 = arith.constant 0 : index
      %48 = vector.load %arg4[%c0_29, %c0_30, %c0_31] : memref<3x8x128xf32, #tpu.memory_space<vmem>>, vector<3x8x128xf32>
      tpu.vector_store %arg4[%c0_29, %c0_30, %c0_31], %47 {strides = array<i32>} : memref<3x8x128xf32, #tpu.memory_space<vmem>>, vector<3x8x128xf32>,
    } else {
    }
    %c0 = arith.constant 0 : index
    %c0_1 = arith.constant 0 : index
    %3 = vector.load %arg1[%c0, %c0_1] : memref<32x128xf32, #tpu.memory_space<vmem>>, vector<32x128xf32>
    %c0_2 = arith.constant 0 : index
    %c0_3 = arith.constant 0 : index
    %4 = vector.load %arg2[%c0_2, %c0_3] : memref<32x128xf32, #tpu.memory_space<vmem>>, vector<32x128xf32>
    %cst = arith.constant 0.000000e+00 : f32
    %5 = vector.broadcast %cst : f32 to vector<32x128xf32>
    %6 = arith.cmpf ogt, %4, %5 : vector<32x128xf32>
    %7 = arith.extui %6 : vector<32x128xi1> to vector<32x128xi32>
    %8 = arith.sitofp %7 : vector<32x128xi32> to vector<32x128xf32>
    %9 = arith.subf %3, %4 : vector<32x128xf32>
    %10 = math.absf %9 : vector<32x128xf32>
    %cst_4 = arith.constant 1.000000e+00 : f32
    %11 = vector.broadcast %cst_4 : f32 to vector<32x128xf32>
    %12 = arith.cmpf olt, %10, %11 : vector<32x128xf32>
    %cst_5 = arith.constant 5.000000e-01 : f32
    %13 = vector.broadcast %cst_5 : f32 to vector<32x128xf32>
    %14 = arith.mulf %13, %9 : vector<32x128xf32>
    %15 = arith.mulf %14, %9 : vector<32x128xf32>
    %cst_6 = arith.constant 5.000000e-01 : f32
    %16 = vector.broadcast %cst_6 : f32 to vector<32x128xf32>
    %17 = arith.subf %10, %16 : vector<32x128xf32>
    %18 = arith.select %12, %15, %17 : vector<32x128xi1>, vector<32x128xf32>
    %19 = arith.mulf %18, %8 : vector<32x128xf32>
    %c0_7 = arith.constant 0 : index
    %c0_8 = arith.constant 0 : index
    %c0_9 = arith.constant 0 : index
    %20 = vector.load %arg4[%c0_7, %c0_8, %c0_9] : memref<3x8x128xf32, #tpu.memory_space<vmem>>, vector<1x8x128xf32>
    %21 = vector.shape_cast %20 : vector<1x8x128xf32> to vector<8x128xf32>
    %22 = vector.shape_cast %18 : vector<32x128xf32> to vector<4x8x128xf32>
    %cst_10 = arith.constant dense<0.000000e+00> : vector<8x128xf32>
    %23 = vector.multi_reduction <add>, %22, %cst_10 [0] : vector<4x8x128xf32> to vector<8x128xf32>
    %24 = arith.addf %21, %23 : vector<8x128xf32>
    %c0_11 = arith.constant 0 : index
    %c0_12 = arith.constant 0 : index
    %c0_13 = arith.constant 0 : index
    %25 = vector.load %arg4[%c0_11, %c0_12, %c0_13] : memref<3x8x128xf32, #tpu.memory_space<vmem>>, vector<1x8x128xf32>
    %26 = vector.shape_cast %25 : vector<1x8x128xf32> to vector<8x128xf32>
    %27 = vector.shape_cast %24 : vector<8x128xf32> to vector<1x8x128xf32>
    tpu.vector_store %arg4[%c0_11, %c0_12, %c0_13], %27 {strides = array<i32>} : memref<3x8x128xf32, #tpu.memory_space<vmem>>, vector<1x8x128xf32>,
    %c1 = arith.constant 1 : index
    %c0_14 = arith.constant 0 : index
    %c0_15 = arith.constant 0 : index
    %28 = vector.load %arg4[%c1, %c0_14, %c0_15] : memref<3x8x128xf32, #tpu.memory_space<vmem>>, vector<1x8x128xf32>
    %29 = vector.shape_cast %28 : vector<1x8x128xf32> to vector<8x128xf32>
    %30 = vector.shape_cast %19 : vector<32x128xf32> to vector<4x8x128xf32>
    %cst_16 = arith.constant dense<0.000000e+00> : vector<8x128xf32>
    %31 = vector.multi_reduction <add>, %30, %cst_16 [0] : vector<4x8x128xf32> to vector<8x128xf32>
    %32 = arith.addf %29, %31 : vector<8x128xf32>
    %c1_17 = arith.constant 1 : index
    %c0_18 = arith.constant 0 : index
    %c0_19 = arith.constant 0 : index
    %33 = vector.load %arg4[%c1_17, %c0_18, %c0_19] : memref<3x8x128xf32, #tpu.memory_space<vmem>>, vector<1x8x128xf32>
    %34 = vector.shape_cast %33 : vector<1x8x128xf32> to vector<8x128xf32>
    %35 = vector.shape_cast %32 : vector<8x128xf32> to vector<1x8x128xf32>
    tpu.vector_store %arg4[%c1_17, %c0_18, %c0_19], %35 {strides = array<i32>} : memref<3x8x128xf32, #tpu.memory_space<vmem>>, vector<1x8x128xf32>,
    %c2 = arith.constant 2 : index
    %c0_20 = arith.constant 0 : index
    %c0_21 = arith.constant 0 : index
    %36 = vector.load %arg4[%c2, %c0_20, %c0_21] : memref<3x8x128xf32, #tpu.memory_space<vmem>>, vector<1x8x128xf32>
    %37 = vector.shape_cast %36 : vector<1x8x128xf32> to vector<8x128xf32>
    %38 = vector.shape_cast %8 : vector<32x128xf32> to vector<4x8x128xf32>
    %cst_22 = arith.constant dense<0.000000e+00> : vector<8x128xf32>
    %39 = vector.multi_reduction <add>, %38, %cst_22 [0] : vector<4x8x128xf32> to vector<8x128xf32>
    %40 = arith.addf %37, %39 : vector<8x128xf32>
    %c2_23 = arith.constant 2 : index
    %c0_24 = arith.constant 0 : index
    %c0_25 = arith.constant 0 : index
    %41 = vector.load %arg4[%c2_23, %c0_24, %c0_25] : memref<3x8x128xf32, #tpu.memory_space<vmem>>, vector<1x8x128xf32>
    %42 = vector.shape_cast %41 : vector<1x8x128xf32> to vector<8x128xf32>
    %43 = vector.shape_cast %40 : vector<8x128xf32> to vector<1x8x128xf32>
    tpu.vector_store %arg4[%c2_23, %c0_24, %c0_25], %43 {strides = array<i32>} : memref<3x8x128xf32, #tpu.memory_space<vmem>>, vector<1x8x128xf32>,
    %c0_i32_26 = arith.constant 0 : i32
    %44 = arith.cmpi eq, %arg0, %c0_i32_26 : i32
    %45 = arith.extui %44 : i1 to i32
    %c0_i32_27 = arith.constant 0 : i32
    %46 = arith.cmpi ne, %45, %c0_i32_27 : i32
    scf.if %46 {
      %c0_28 = arith.constant 0 : index
      %c0_29 = arith.constant 0 : index
      %c0_30 = arith.constant 0 : index
      %47 = vector.load %arg4[%c0_28, %c0_29, %c0_30] : memref<3x8x128xf32, #tpu.memory_space<vmem>>, vector<1x8x128xf32>
      %48 = vector.shape_cast %47 : vector<1x8x128xf32> to vector<8x128xf32>
      %49 = vector.shape_cast %48 : vector<8x128xf32> to vector<1x8x128xf32>
      %cst_31 = arith.constant dense<0.000000e+00> : vector<1xf32>
      %50 = vector.multi_reduction <add>, %49, %cst_31 [1, 2] : vector<1x8x128xf32> to vector<1xf32>
      %51 = vector.shape_cast %50 : vector<1xf32> to vector<1x1x1xf32>
      %52 = vector.extract %51[0, 0, 0] : f32 from vector<1x1x1xf32>
      %c0_32 = arith.constant 0 : index
      %53 = memref.load %arg3[%c0_32] : memref<3xf32, #tpu.memory_space<smem>>
      memref.store %52, %arg3[%c0_32] : memref<3xf32, #tpu.memory_space<smem>>
      %c1_33 = arith.constant 1 : index
      %c0_34 = arith.constant 0 : index
      %c0_35 = arith.constant 0 : index
      %54 = vector.load %arg4[%c1_33, %c0_34, %c0_35] : memref<3x8x128xf32, #tpu.memory_space<vmem>>, vector<1x8x128xf32>
      %55 = vector.shape_cast %54 : vector<1x8x128xf32> to vector<8x128xf32>
      %56 = vector.shape_cast %55 : vector<8x128xf32> to vector<1x8x128xf32>
      %cst_36 = arith.constant dense<0.000000e+00> : vector<1xf32>
      %57 = vector.multi_reduction <add>, %56, %cst_36 [1, 2] : vector<1x8x128xf32> to vector<1xf32>
      %58 = vector.shape_cast %57 : vector<1xf32> to vector<1x1x1xf32>
      %59 = vector.extract %58[0, 0, 0] : f32 from vector<1x1x1xf32>
      %c1_37 = arith.constant 1 : index
      %60 = memref.load %arg3[%c1_37] : memref<3xf32, #tpu.memory_space<smem>>
      memref.store %59, %arg3[%c1_37] : memref<3xf32, #tpu.memory_space<smem>>
      %c2_38 = arith.constant 2 : index
      %c0_39 = arith.constant 0 : index
      %c0_40 = arith.constant 0 : index
      %61 = vector.load %arg4[%c2_38, %c0_39, %c0_40] : memref<3x8x128xf32, #tpu.memory_space<vmem>>, vector<1x8x128xf32>
      %62 = vector.shape_cast %61 : vector<1x8x128xf32> to vector<8x128xf32>
      %63 = vector.shape_cast %62 : vector<8x128xf32> to vector<1x8x128xf32>
      %cst_41 = arith.constant dense<0.000000e+00> : vector<1xf32>
      %64 = vector.multi_reduction <add>, %63, %cst_41 [1, 2] : vector<1x8x128xf32> to vector<1xf32>
      %65 = vector.shape_cast %64 : vector<1xf32> to vector<1x1x1xf32>
      %66 = vector.extract %65[0, 0, 0] : f32 from vector<1x1x1xf32>
      %c2_42 = arith.constant 2 : index
      %67 = memref.load %arg3[%c2_42] : memref<3xf32, #tpu.memory_space<smem>>
      memref.store %66, %arg3[%c2_42] : memref<3xf32, #tpu.memory_space<smem>>
    } else {
    }
    return
  }
  func.func @transform_0(%arg0: i32) -> (i32, i32) {
    %c0_i32 = arith.constant 0 : i32
    %c0_i32_0 = arith.constant 0 : i32
    return %arg0, %c0_i32 : i32, i32
  }
  func.func @transform_1(%arg0: i32) -> (i32, i32) {
    %c0_i32 = arith.constant 0 : i32
    %c0_i32_0 = arith.constant 0 : i32
    return %arg0, %c0_i32 : i32, i32
  }
  func.func @transform_2(%arg0: i32) -> i32 {
    %c0_i32 = arith.constant 0 : i32
    %c0_i32_0 = arith.constant 0 : i32
    return %c0_i32 : i32
  }
}

</mosaic_0001>

<bundles_post_ra>
// kernel: reg_l1_loss.1
= control target key start
LH: loop header
LB: loop body
LE: loop exit
PB: predicated region body
PF: predicated region fallthrough
CT: control target
= control target key end

     0   :  { %v175_v6 = vmov 0.0   ;;  %s219_s0 = inlined_call_operand.vmem [shape: f32[32,128], index: 0, kind: input, shape index: {}]   ;;  %s220_s1 = inlined_call_operand.vmem [shape: f32[32,128], index: 1, kind: input, shape index: {}]   ;;  %s221_s2 = inlined_call_operand.vmem [shape: f32[3], index: 2, kind: output, shape index: {}]  }
   0x1   :  { %v23_v0 = vld [vmem:[%s220_s1] sm:$0xff]  ;;  %v24_v1 = vld [vmem:[%s220_s1 + $0x8] sm:$0xff]  ;;  %v25_v2 = vld [vmem:[%s220_s1 + $0x10] sm:$0xff] }
   0x2   :  { %v26_v3 = vld [vmem:[%s220_s1 + $0x18] sm:$0xff]  ;;  %vm27_vm0 = vcmp.gt.f32.partialorder %v23_v0, 0.0  ;;  %vm28_vm1 = vcmp.gt.f32.partialorder %v24_v1, 0.0  ;;  %vm29_vm2 = vcmp.gt.f32.partialorder %v25_v2, 0.0  ;;  %v19_v4 = vld [vmem:[%s219_s0] sm:$0xff]  ;;  %v20_v5 = vld [vmem:[%s219_s0 + $0x8] sm:$0xff] }
   0x3   :  { %vm30_vm3 = vcmp.gt.f32.partialorder %v26_v3, 0.0  ;;  %v145_v7 = vsel %vm27_vm0, 1.0, %v175_v6  ;;  %v146_v8 = vsel %vm28_vm1, 1.0, %v175_v6  ;;  %v147_v9 = vsel %vm29_vm2, 1.0, %v175_v6  ;;  %v21_v10 = vld [vmem:[%s219_s0 + $0x10] sm:$0xff]  ;;  %v22_v11 = vld [vmem:[%s219_s0 + $0x18] sm:$0xff] }
   0x4   :  { %v86_v12 = vadd.f32 %v146_v8, %v145_v7  ;;  %v39_v13 = vsub.f32 %v19_v4, %v23_v0  ;;  %v40_v14 = vsub.f32 %v20_v5, %v24_v1 }
   0x5   :  { %7 = vsyncpa [#allocation4], 0  ;;  %v148_v15 = vsel %vm30_vm3, 1.0, %v175_v6  ;;  %v41_v16 = vsub.f32 %v21_v10, %v25_v2  ;;  %v42_v17 = vsub.f32 %v22_v11, %v26_v3  ;;  %s136_s26 = sshll.u32 %s221_s2, 4  ;;  %s137_s26 = int_to_ptr.vmem [resolvable:$true] %s136_s26 }
   0x6   :  { %v87_v18 = vadd.f32 %v147_v9, %v86_v12  ;;  %v43_v19 = vand.u32 2147483647, %v39_v13  ;;  %v44_v20 = vand.u32 2147483647, %v40_v14  ;;  %v51_v21 = vmul.f32 0.5, %v39_v13  ;;  %s161_s29 = scalar_lea.vmem %s137_s26, 16  ;;  %p166_p1 = scmp.lt.s32.totalorder %s137_s26, %s137_s26 }
   0x7   :  { %v45_v22 = vand.u32 2147483647, %v41_v16  ;;  %v46_v23 = vand.u32 2147483647, %v42_v17  ;;  %v52_v24 = vmul.f32 0.5, %v40_v14  ;;  %v53_v25 = vmul.f32 0.5, %v41_v16  ;;  %p162_p0 = scmp.ne.s32.totalorder %s137_s26, %s161_s29  ;;  %p167_p2 = scmp.lt.s32.totalorder %s161_s29, %s161_s29 }
   0x8   :  { %v88_v26 = vadd.f32 %v148_v15, %v87_v18  ;;  %vm47_vm4 = vcmp.lt.f32.partialorder %v43_v19, 1.0  ;;  %v54_v27 = vmul.f32 0.5, %v42_v17  ;;  %vm48_vm5 = vcmp.lt.f32.partialorder %v44_v20, 1.0 }
   0x9   :  { %vm49_vm6 = vcmp.lt.f32.partialorder %v45_v22, 1.0  ;;  %v55_v28 = vmul.f32 %v51_v21, %v39_v13  ;;  %v56_v29 = vmul.f32 %v52_v24, %v40_v14  ;;  %v57_v30 = vmul.f32 %v53_v25, %v41_v16  ;;  %p168_p3 = por %p167_p2, %p166_p1 }
   0xa   :  { %119 = vadd.xlane.f32.xlu1 %v88_v26  ;;  %v58_v31 = vmul.f32 %v54_v27, %v42_v17  ;;  %v149_v32 = vadd.f32 -0.5, %v43_v19  ;;  %v150_v33 = vadd.f32 -0.5, %v44_v20  ;;  %vm50_vm7 = vcmp.lt.f32.partialorder %v46_v23, 1.0 }
   0xb   :  { %v151_v34 = vadd.f32 -0.5, %v45_v22  ;;  %v152_v35 = vadd.f32 -0.5, %v46_v23  ;;  %p169_p4 = pnand %p168_p3, %p162_p0 }
   0xc   :  { %v63_v36 = vsel %vm47_vm4, %v55_v28, %v149_v32  ;;  %v64_v37 = vsel %vm48_vm5, %v56_v29, %v150_v33 }
   0xd   :  { %v65_v38 = vsel %vm49_vm6, %v57_v30, %v151_v34  ;;  %v68_v39 = vmul.f32 %v146_v8, %v64_v37  ;;  %v72_v40 = vadd.f32 %v64_v37, %v63_v36  ;;  %v66_v41 = vsel %vm50_vm7, %v58_v31, %v152_v35 }
   0xe   :  { %v69_v42 = vmul.f32 %v147_v9, %v65_v38  ;;  %v67_v43 = vmul.f32 %v145_v7, %v63_v36  ;;  %v70_v45 = vmul.f32 %v148_v15, %v66_v41 }
   0xf   :  { %v73_v44 = vadd.f32 %v72_v40, %v65_v38 }
  0x10   :  { %v79_v46 = vadd.f32 %v68_v39, %v67_v43 }
  0x11   :  { %v74_v47 = vadd.f32 %v73_v44, %v66_v41 }
  0x12   :  { %v80_v48 = vadd.f32 %v79_v46, %v69_v42 }
  0x13   :  { %95 = vadd.xlane.f32.xlu0 %v74_v47 }
  0x14   :  { %v81_v49 = vadd.f32 %v80_v48, %v70_v45 }
  0x17   :  { %107 = vadd.xlane.f32.xlu0 %v81_v49 }
  0x97   :  { %v120_v50 = vpop.xlane.xlu1 %119 }
  0x98   :  { %v121_v51 = vrot.slane %v120_v50, 4 }
  0x9a   :  { %v122_v52 = vadd.f32 %v121_v51, %v120_v50 }
  0x9c   :  { %v123_v56 = vrot.slane %v122_v52, 2 }
  0x9e   :  { %v124_v62 = vadd.f32 %v123_v56, %v122_v52 }
  0xa0   :  { %v96_v53 = vpop.xlane.xlu0 %95  ;;  %v125_v3 = vrot.slane %v124_v62, 1 }
  0xa1   :  { %v97_v54 = vrot.slane %v96_v53, 4 }
  0xa2   :  { %v126_v6 = vadd.f32 %v125_v3, %v124_v62 }
  0xa3   :  { %v98_v55 = vadd.f32 %v97_v54, %v96_v53 }
  0xa4   :  { %v108_v57 = vpop.xlane.xlu0 %107 }
  0xa5   :  { %v99_v58 = vrot.slane %v98_v55, 2  ;;  %v109_v59 = vrot.slane %v108_v57, 4 }
  0xa7   :  { %v110_v60 = vadd.f32 %v109_v59, %v108_v57  ;;  %v100_v61 = vadd.f32 %v99_v58, %v98_v55 }
  0xa9   :  { %v111_v63 = vrot.slane %v110_v60, 2  ;;  %v101_v0 = vrot.slane %v100_v61, 1 }
  0xab   :  { %v112_v1 = vadd.f32 %v111_v63, %v110_v60  ;;  %v102_v2 = vadd.f32 %v101_v0, %v100_v61 }
  0xad   :  { %153 = vpush %v102_v2  ;;  %v113_v4 = vrot.slane %v112_v1, 1 }
  0xaf   :  { %v114_v5 = vadd.f32 %v113_v4, %v112_v1 }
  0xb1   :  { %155 = vpush %v114_v5 }
  0xb2   :  { %157 = vpush %v126_v6 }
  0xde   :  { %s154_s0 = spop %153 }
  0xdf   :  { %105 = sst [smem:[#allocation3]] %s154_s0 }
  0xe2   :  { %s156_s27 = spop %155 }
  0xe3   :  { %117 = sst [smem:[#allocation3 + $0x1]] %s156_s27  ;;  %s158_s28 = spop %157 }
  0xe4   :  { %129 = sst [smem:[#allocation3 + $0x2]] %s158_s28 }
  0xe5   :  { %172 = shalt.err (!%p169_p4)
}
  0xe6   :  { %s176_s30 = smov [#allocation3]  }
  0xe7   :  { %139 = dma.smem_to_vmem %s176_s30, 16, %s137_s26, [#allocation4]  }
  0xe8   :  { %173 = dma.done.wait [#allocation4], 16  }
  0xe9   :  { %174 = vsyncadd [#allocation4], 4294967280 }
  0xea   :  { %143 = sfence }
  0xeb   :  { %144 = vsyncpa [#allocation4], 1 }

</bundles_post_ra>
